<compile_context>
chip_gen: v5e
topology: v5e:2x2
jax: 0.10.0
libtpu: 0.0.40
codegen_flags: <defaults>
</compile_context>

<pallas_src>
import numpy as np

import jax
import jax.numpy as jnp
from jax.experimental import pallas as pl
from jax.experimental.pallas import tpu as pltpu


def _dwt_kernel(x_ref, m_ref, o_ref):
    """One block.

    x_ref : (tm, 2*W)    row-pairs, each row = [even image row | odd image row]
    m_ref : (2*W, 4*Wh)  constant Haar combine matrix (columns = LL|HL|LH|HH)
    o_ref : (4, tm, Wh)  output subbands
    """
    wh = o_ref.shape[-1]
    y = jnp.dot(x_ref[...], m_ref[...], preferred_element_type=jnp.float32)
    y = y.astype(o_ref.dtype)
    o_ref[0] = y[:, 0 * wh:1 * wh]   # LL
    o_ref[1] = y[:, 1 * wh:2 * wh]   # HL
    o_ref[2] = y[:, 2 * wh:3 * wh]   # LH
    o_ref[3] = y[:, 3 * wh:4 * wh]   # HH


def _haar_combine_matrix(W, dtype):
    """Constant (2W, 4*Wh) matrix: [even_row | odd_row] @ M = [LL|HL|LH|HH]."""
    Wh = W // 2
    M = np.zeros((2 * W, 4 * Wh), dtype=np.float32)
    c = np.arange(Wh)
    # Signs of (x1, x2, x3, x4) per subband; x1=even-row/even-col,
    # x2=odd/even, x3=even/odd, x4=odd/odd.  The 0.5 carries the "/2".
    signs = ((+1, +1, +1, +1),   # LL =  x1 + x2 + x3 + x4
             (-1, -1, +1, +1),   # HL = -x1 - x2 + x3 + x4
             (-1, +1, -1, +1),   # LH = -x1 + x2 - x3 + x4
             (+1, -1, -1, +1))   # HH =  x1 - x2 - x3 + x4
    for g, (s1, s2, s3, s4) in enumerate(signs):
        M[2 * c,         g * Wh + c] = 0.5 * s1   # even row, even col  (x1)
        M[W + 2 * c,     g * Wh + c] = 0.5 * s2   # odd  row, even col  (x2)
        M[2 * c + 1,     g * Wh + c] = 0.5 * s3   # even row, odd  col  (x3)
        M[W + 2 * c + 1, g * Wh + c] = 0.5 * s4   # odd  row, odd  col  (x4)
    return jnp.asarray(M, dtype=dtype)


def _vmem_tuning():
    """(block_bytes, vmem_limit_bytes) chosen per TPU generation."""
    try:
        cap = pltpu.get_tpu_info().vmem_capacity_bytes
    except Exception:
        cap = 64 * 1024 * 1024
    if cap >= 100 * 1024 * 1024:               # v5e / v6e: 128 MiB VMEM
        return 8 * 1024 * 1024, 64 * 1024 * 1024
    return 4 * 1024 * 1024, 32 * 1024 * 1024   # v7x: 64 MiB VMEM


def _pick_rows(R, row_elems, itemsize, target_bytes):
    """Rows-per-block: divides R, multiple of 8 (or full extent), ~target size,
    and leaves >= 2 grid steps when possible (v7x megacore)."""
    row_bytes = row_elems * itemsize
    max_rows = max(1, target_bytes // row_bytes)
    best = None
    for cand in range(8, R + 1, 8):
        if R % cand == 0 and cand <= max_rows:
            best = cand
    if best is None:
        # No multiple-of-8 divisor fits the budget: full extent is always legal.
        return R
    if best == R:
        # Keep at least 2 grid steps so both TensorCores get work.
        for cand in range(best - 8, 7, -8):
            if R % cand == 0:
                return cand
    return best


@jax.jit
def dwt(x):
    """Haar DWT forward: (B, C, H, W) -> (4*B, C, H//2, W//2) (== dwt_init)."""
    B, C, H, W = x.shape
    if H % 2 or W % 2:
        raise ValueError(f"DWT requires even spatial dims, got H={H}, W={W}")
    Hh, Wh = H // 2, W // 2
    R = B * C * Hh                      # one 2-D row per output row (row pair)

    # Free, metadata-only reshape: each row = [even image row | odd image row].
    xr = x.reshape(R, 2 * W)
    m_dtype = x.dtype if jnp.issubdtype(x.dtype, jnp.floating) else jnp.float32
    M = _haar_combine_matrix(W, m_dtype)

    block_bytes, vmem_limit = _vmem_tuning()
    itemsize = jnp.dtype(x.dtype).itemsize
    tm = _pick_rows(R, 2 * W, itemsize, block_bytes)

    out = pl.pallas_call(
        _dwt_kernel,
        out_shape=jax.ShapeDtypeStruct((4, R, Wh), x.dtype),
        grid=(R // tm,),
        in_specs=[
            pl.BlockSpec((tm, 2 * W), lambda i: (i, 0)),
            pl.BlockSpec((2 * W, 4 * Wh), lambda i: (0, 0)),  # resident in VMEM
        ],
        out_specs=pl.BlockSpec((4, tm, Wh), lambda i: (0, i, 0)),
        compiler_params=pltpu.CompilerParams(
            dimension_semantics=("parallel",),
            vmem_limit_bytes=vmem_limit,
        ),
    )(xr, M)

    # (4, R, Wh) -> (4, B, C, Hh, Wh) -> (4*B, C, Hh, Wh): free reshapes,
    # matching torch.cat((LL, HL, LH, HH), dim=0) ordering.
    return out.reshape(4, B, C, Hh, Wh).reshape(4 * B, C, Hh, Wh)


def dwt_reference(x):
    """Pure-JAX reference matching the PyTorch dwt_init exactly."""
    x01 = x[:, :, 0::2, :] / 2
    x02 = x[:, :, 1::2, :] / 2
    x1 = x01[:, :, :, 0::2]
    x2 = x02[:, :, :, 0::2]
    x3 = x01[:, :, :, 1::2]
    x4 = x02[:, :, :, 1::2]
    x_LL = x1 + x2 + x3 + x4
    x_HL = -x1 - x2 + x3 + x4
    x_LH = -x1 + x2 - x3 + x4
    x_HH = x1 - x2 - x3 + x4
    return jnp.concatenate((x_LL, x_HL, x_LH, x_HH), axis=0)


if __name__ == "__main__":
    key = jax.random.PRNGKey(0)

    # Primary test shape (matches the module's expected small NCHW input).
    B, C, H, W = 2, 4, 16, 16
    x = jax.random.normal(key, (B, C, H, W), dtype=jnp.float32)

    y = dwt(x)
    jax.block_until_ready(y)
    y_ref = dwt_reference(x)
    assert y.shape == (4 * B, C, H // 2, W // 2)
    assert jnp.allclose(y, y_ref, atol=1e-5, rtol=1e-5)

    # Secondary shape: different aspect ratio / row-block count.
    x2 = jax.random.normal(jax.random.PRNGKey(1), (1, 3, 32, 64), dtype=jnp.float32)
    y2 = dwt(x2)
    jax.block_until_ready(y2)
    assert jnp.allclose(y2, dwt_reference(x2), atol=1e-5, rtol=1e-5)

    print("KERNEL_OK")
</pallas_src>

<mosaic_0001>
module attributes {stable_mosaic.version = 11 : i64} {
  func.func @_dwt_kernel(%arg0: i32, %arg1: memref<32x32xf32, #tpu.memory_space<vmem>>, %arg2: memref<32x32xf32, #tpu.memory_space<vmem>>, %arg3: memref<4x32x8xf32, #tpu.memory_space<vmem>>) attributes {dimension_semantics = [#tpu.dimension_semantics<parallel>], iteration_bounds = array<i64: 2>, scalar_prefetch = 0 : i64, scratch_operands = 0 : i64, tpu.core_type = #tpu.core_type<tc>, window_params = [{transform_indices = @transform_0, window_bounds = array<i64: 32, 32>}, {pipeline_mode = #tpu.pipeline_mode<synchronous>, transform_indices = @transform_1, window_bounds = array<i64: 32, 32>}, {transform_indices = @transform_2, window_bounds = array<i64: 4, 32, 8>}]} {
    %c0 = arith.constant 0 : index
    %c0_0 = arith.constant 0 : index
    %0 = vector.load %arg1[%c0, %c0_0] : memref<32x32xf32, #tpu.memory_space<vmem>>, vector<32x32xf32>
    %c0_1 = arith.constant 0 : index
    %c0_2 = arith.constant 0 : index
    %1 = vector.load %arg2[%c0_1, %c0_2] : memref<32x32xf32, #tpu.memory_space<vmem>>, vector<32x32xf32>
    %cst = arith.constant dense<0.000000e+00> : vector<32x32xf32>
    %2 = tpu.matmul %0, %1, %cst {dimension_numbers = #tpu.dot_dimension_numbers<[1], [0], [0], [1], [0, 0, 1, 1], [], []>} : vector<32x32xf32>, vector<32x32xf32>, vector<32x32xf32> -> vector<32x32xf32>
    %3 = vector.extract_strided_slice %2 {offsets = [0, 0], sizes = [32, 8], strides = [1, 1]} : vector<32x32xf32> to vector<32x8xf32>
    %c0_3 = arith.constant 0 : index
    %c0_4 = arith.constant 0 : index
    %c0_5 = arith.constant 0 : index
    %4 = vector.load %arg3[%c0_3, %c0_4, %c0_5] : memref<4x32x8xf32, #tpu.memory_space<vmem>>, vector<1x32x8xf32>
    %5 = vector.shape_cast %4 : vector<1x32x8xf32> to vector<32x8xf32>
    %6 = vector.shape_cast %3 : vector<32x8xf32> to vector<1x32x8xf32>
    tpu.vector_store %arg3[%c0_3, %c0_4, %c0_5], %6 {strides = array<i32>} : memref<4x32x8xf32, #tpu.memory_space<vmem>>, vector<1x32x8xf32>,
    %7 = vector.extract_strided_slice %2 {offsets = [0, 8], sizes = [32, 8], strides = [1, 1]} : vector<32x32xf32> to vector<32x8xf32>
    %c1 = arith.constant 1 : index
    %c0_6 = arith.constant 0 : index
    %c0_7 = arith.constant 0 : index
    %8 = vector.load %arg3[%c1, %c0_6, %c0_7] : memref<4x32x8xf32, #tpu.memory_space<vmem>>, vector<1x32x8xf32>
    %9 = vector.shape_cast %8 : vector<1x32x8xf32> to vector<32x8xf32>
    %10 = vector.shape_cast %7 : vector<32x8xf32> to vector<1x32x8xf32>
    tpu.vector_store %arg3[%c1, %c0_6, %c0_7], %10 {strides = array<i32>} : memref<4x32x8xf32, #tpu.memory_space<vmem>>, vector<1x32x8xf32>,
    %11 = vector.extract_strided_slice %2 {offsets = [0, 16], sizes = [32, 8], strides = [1, 1]} : vector<32x32xf32> to vector<32x8xf32>
    %c2 = arith.constant 2 : index
    %c0_8 = arith.constant 0 : index
    %c0_9 = arith.constant 0 : index
    %12 = vector.load %arg3[%c2, %c0_8, %c0_9] : memref<4x32x8xf32, #tpu.memory_space<vmem>>, vector<1x32x8xf32>
    %13 = vector.shape_cast %12 : vector<1x32x8xf32> to vector<32x8xf32>
    %14 = vector.shape_cast %11 : vector<32x8xf32> to vector<1x32x8xf32>
    tpu.vector_store %arg3[%c2, %c0_8, %c0_9], %14 {strides = array<i32>} : memref<4x32x8xf32, #tpu.memory_space<vmem>>, vector<1x32x8xf32>,
    %15 = vector.extract_strided_slice %2 {offsets = [0, 24], sizes = [32, 8], strides = [1, 1]} : vector<32x32xf32> to vector<32x8xf32>
    %c3 = arith.constant 3 : index
    %c0_10 = arith.constant 0 : index
    %c0_11 = arith.constant 0 : index
    %16 = vector.load %arg3[%c3, %c0_10, %c0_11] : memref<4x32x8xf32, #tpu.memory_space<vmem>>, vector<1x32x8xf32>
    %17 = vector.shape_cast %16 : vector<1x32x8xf32> to vector<32x8xf32>
    %18 = vector.shape_cast %15 : vector<32x8xf32> to vector<1x32x8xf32>
    tpu.vector_store %arg3[%c3, %c0_10, %c0_11], %18 {strides = array<i32>} : memref<4x32x8xf32, #tpu.memory_space<vmem>>, vector<1x32x8xf32>,
    return
  }
  func.func @transform_0(%arg0: i32) -> (i32, i32) {
    %c0_i32 = arith.constant 0 : i32
    %c0_i32_0 = arith.constant 0 : i32
    return %arg0, %c0_i32 : i32, i32
  }
  func.func @transform_1(%arg0: i32) -> (i32, i32) {
    %c0_i32 = arith.constant 0 : i32
    %c0_i32_0 = arith.constant 0 : i32
    %c0_i32_1 = arith.constant 0 : i32
    return %c0_i32, %c0_i32_0 : i32, i32
  }
  func.func @transform_2(%arg0: i32) -> (i32, i32, i32) {
    %c0_i32 = arith.constant 0 : i32
    %c0_i32_0 = arith.constant 0 : i32
    %c0_i32_1 = arith.constant 0 : i32
    return %c0_i32, %arg0, %c0_i32_0 : i32, i32, i32
  }
}

</mosaic_0001>

<bundles_post_ra>
// kernel: dwt.1
= control target key start
LH: loop header
LB: loop body
LE: loop exit
PB: predicated region body
PF: predicated region fallthrough
CT: control target
= control target key end

     0   :  { %7 = vsyncpa [#allocation3], 0  ;;  %s656_s0 = inlined_call_operand.vmem [shape: f32[64,32], index: 0, kind: input, shape index: {}]   ;;  %s657_s1 = inlined_call_operand.vmem [shape: f32[32,32], index: 1, kind: input, shape index: {}]   ;;  %s658_s2 = inlined_call_operand.hbm [shape: f32[4,64,8], index: 2, kind: output, shape index: {}]  }
   0x1   :  { %9 = vsyncpa [#allocation3 + $0x1], 0  ;;  %s513_s9 = smov 0   ;;  %s515_s10 = smov 0  }
   0x2   :  { %s517_s11 = smov 0   ;;  %s519_s12 = smov 0  }
   0x3 LB: > { %s534_s13 = sadd.s32 4294967295, %s486_s12   ;;  %s356_s14 = sadd.s32 4294967294, %s486_s12   ;;  %s486_s12 = sphi %s519_s12, %s664_s12   ;;  %s482_s11 = sphi %s517_s11, %s663_s11   ;;  %s478_s10 = sphi %s515_s10, %s662_s10   ;;  %s474_s9 = sphi %s513_s9, %s661_s9  }
   0x4   : > { %s538_s15 = sadd.s32 1, %s486_s12   ;;  %s69_s16 = sadd.s32 1, %s482_s11 }
   0x5   : > { %s66_s17 = ssub.s32 %s486_s12, %s538_s15  ;;  %p79_p0 = scmp.ne.s32.totalorder %s482_s11, %s478_s10 }
   0x6   : > { %p67_p1 = scmp.eq.s32.totalorder %s66_s17, 0  ;;  %p80_p2 = scmp.eq.s32.totalorder %s534_s13, 1 }
   0x7   : > { %p85_p3 = scmp.ne.s32.totalorder %s478_s10, %s474_s9  ;;  %p86_p4 = scmp.eq.s32.totalorder %s356_s14, 1 }
   0x8   : > { %s549_s18 = scalar_select %p67_p1, %s482_s11, %s69_s16  }
   0x9   : > { %p551_p5 = por %p80_p2, %p79_p0  ;;  %p555_p6 = por %p86_p4, %p85_p3 }
   0xa   : > { %p359_p7 = scmp.ge.s32.totalorder %s486_s12, 1  ;;  %p116_p8 = scmp.lt.s32.totalorder %s486_s12, 3 }
   0xc   : > { %p117_p9 = pnand %p359_p7, %p116_p8 }
   0xd   : > { %s361_s25 = sshll.u32 (!%p117_p9), %s534_s13, 2  ;;  %s135_s3 = sand.u32 (!%p117_p9), 1, %s478_s10  }
   0xe   : > { %120 = sbr.rel (%p117_p9) target bundleno = 309 (0x135), region = 28  ;;  %p139_p10 = scmp.lt.s32.totalorder (!%p117_p9), %s361_s25, 7 }
   0xf   : > { %s360_s7 = sshll.u32 (!%p117_p9), %s135_s3, 7  ;;  %s488_s14 = smov (!%p117_p9), 112  }
  0x10   : > { %s584_s8 = scalar_lea.vmem (!%p117_p9), [#allocation2], %s360_s7  ;;  %s489_s16 = smov (!%p117_p9), 120  }
  0x11   : > { %s490_s17 = smov (!%p117_p9), 104   ;;  %s256_s21 = scalar_lea.sflag (!%p117_p9), [#allocation3], %s135_s3 }
  0x13   : > { %v152_v0 = vld [vmem:[%s657_s1 + $0x18] sm:$0xff]  ;;  %v151_v1 = vld [vmem:[%s657_s1 + $0x10] sm:$0xff]  ;;  %v150_v2 = vld [vmem:[%s657_s1 + $0x8] sm:$0xff]  ;;  %s666_s25 = smov (!%p139_p10, %s361_s25), 7  ;;  %vm153_vm0 = vcmask 261120   ;;  %vm195_vm1 = vcmask 64512  }
  0x14   : > { %178 = vmatpush.msra.mxu0 %v152_v0  ;;  %386 = vmatpush.msra.mxu2 %v152_v0  ;;  %v149_v3 = vld [vmem:[%s657_s1] sm:$0xff]  ;;  %s362_s30 = sshll.u32 %s666_s25, 3 }
  0x15   : > { %385 = vmatpush.msra.mxu1 %v152_v0  ;;  %387 = vmatpush.msra.mxu3 %v152_v0  ;;  %s142_s6 = scalar_lea.vmem %s656_s0, %s362_s30 }
  0x16   : > { %179 = vmatpush.msra.mxu0 %v151_v1  ;;  %389 = vmatpush.msra.mxu2 %v151_v1  ;;  %v145_v4 = vld [vmem:[%s142_s6] sm:$0xff]  ;;  %v147_v5 = vld [vmem:[%s142_s6 + $0x10] sm:$0xff]  ;;  %v146_v6 = vld [vmem:[%s142_s6 + $0x8] sm:$0xff] }
  0x17   : > { %388 = vmatpush.msra.mxu1 %v151_v1  ;;  %390 = vmatpush.msra.mxu3 %v151_v1  ;;  %v148_v7 = vld [vmem:[%s142_s6 + $0x18] sm:$0xff] }
  0x18   : > { %180 = vmatpush.msra.mxu0 %v150_v2  ;;  %392 = vmatpush.msra.mxu2 %v150_v2 }
  0x19   : > { %391 = vmatpush.msra.mxu1 %v150_v2  ;;  %393 = vmatpush.msra.mxu3 %v150_v2 }
  0x1a   : > { %181 = vmatpush.msra.mxu0 %v149_v3  ;;  %395 = vmatpush.msra.mxu2 %v149_v3 }
  0x1b   : > { %363 = vmatmul.msk.f32.vlgmr.msra.gmra.mxu0 %vm153_vm0, %v145_v4  ;;  %365 = vmatmul.msk.f32.vlgmr.msra.gmra.mxu2 %vm153_vm0, %v147_v5 }
  0x1c   : > { %394 = vmatpush.msra.mxu1 %v149_v3  ;;  %396 = vmatpush.msra.mxu3 %v149_v3 }
  0x1d   : > { %364 = vmatmul.msk.f32.vlgmr.msra.gmra.mxu1 %vm153_vm0, %v146_v6  ;;  %366 = vmatmul.msk.f32.vlgmr.msra.gmra.mxu3 %vm153_vm0, %v148_v7 }
  0x98   : > { %v183_v8 = vpop.f32.mrf.mxu0 }
  0x99   : > { %196 = vst.msk [vmem:[%s584_s8] sm:$0xff] %vm195_vm1, %v183_v8  ;;  %221 = vrot.lane.b32.xlu2 %v183_v8, %s488_s14  ;;  %204 = vrot.lane.b32.xlu0 %v183_v8, %s489_s16 }
  0x9a   : > { %v186_v9 = vpop.f32.mrf.mxu1 }
  0x9b   : > { %197 = vst.msk [vmem:[%s584_s8 + $0x8] sm:$0xff] %vm195_vm1, %v186_v9 }
  0x9e   : > { %v189_v10 = vpop.f32.mrf.mxu2 }
  0x9f   : > { %198 = vst.msk [vmem:[%s584_s8 + $0x10] sm:$0xff] %vm195_vm1, %v189_v10  ;;  %208 = vrot.lane.b32.xlu1 %v189_v10, %s489_s16 }
  0xa0   : > { %v192_v11 = vpop.f32.mrf.mxu3 }
  0xa1   : > { %223 = vrot.lane.b32.xlu2 %v186_v9, %s488_s14  ;;  %206 = vrot.lane.b32.xlu0 %v186_v9, %s489_s16  ;;  %199 = vst.msk [vmem:[%s584_s8 + $0x18] sm:$0xff] %vm195_vm1, %v192_v11 }
  0xa7   : > { %210 = vrot.lane.b32.xlu1 %v192_v11, %s489_s16 }
  0xa9   : > { %238 = vrot.lane.b32.xlu2 %v183_v8, %s490_s17  ;;  %225 = vrot.lane.b32.xlu0 %v189_v10, %s488_s14 }
  0xaf   : > { %227 = vrot.lane.b32.xlu1 %v192_v11, %s488_s14 }
  0xb1   : > { %244 = vrot.lane.b32.xlu2 %v192_v11, %s490_s17  ;;  %240 = vrot.lane.b32.xlu0 %v186_v9, %s490_s17 }
  0xb7   : > { %242 = vrot.lane.b32.xlu1 %v189_v10, %s490_s17 }
  0xf3   : > { %v222_v12 = vpop.permute.xlu2 %221 }
  0xf4   : > { %371 = vst.msk [vmem:[%s584_s8 + $0x40] sm:$0xff] %vm195_vm1, %v222_v12 }
  0xfb   : > { %v224_v13 = vpop.permute.xlu2 %223 }
  0xfc   : > { %372 = vst.msk [vmem:[%s584_s8 + $0x48] sm:$0xff] %vm195_vm1, %v224_v13 }
 0x103   : > { %v239_v14 = vpop.permute.xlu2 %238 }
 0x104   : > { %375 = vst.msk [vmem:[%s584_s8 + $0x60] sm:$0xff] %vm195_vm1, %v239_v14 }
 0x10b   : > { %v245_v15 = vpop.permute.xlu2 %244  ;;  %v205_v16 = vpop.permute.xlu0 %204 }
 0x10c   : > { %378 = vst.msk [vmem:[%s584_s8 + $0x78] sm:$0xff] %vm195_vm1, %v245_v15 }
 0x10d   : > { %367 = vst.msk [vmem:[%s584_s8 + $0x20] sm:$0xff] %vm195_vm1, %v205_v16 }
 0x111   : > { %v209_v17 = vpop.permute.xlu1 %208 }
 0x112   : > { %369 = vst.msk [vmem:[%s584_s8 + $0x30] sm:$0xff] %vm195_vm1, %v209_v17 }
 0x113   : > { %v207_v18 = vpop.permute.xlu0 %206 }
 0x114   : > { %368 = vst.msk [vmem:[%s584_s8 + $0x28] sm:$0xff] %vm195_vm1, %v207_v18 }
 0x119   : > { %v211_v19 = vpop.permute.xlu1 %210 }
 0x11a   : > { %370 = vst.msk [vmem:[%s584_s8 + $0x38] sm:$0xff] %vm195_vm1, %v211_v19 }
 0x11b   : > { %v226_v20 = vpop.permute.xlu0 %225 }
 0x11c   : > { %373 = vst.msk [vmem:[%s584_s8 + $0x50] sm:$0xff] %vm195_vm1, %v226_v20 }
 0x121   : > { %v228_v21 = vpop.permute.xlu1 %227 }
 0x122   : > { %374 = vst.msk [vmem:[%s584_s8 + $0x58] sm:$0xff] %vm195_vm1, %v228_v21 }
 0x123   : > { %v241_v22 = vpop.permute.xlu0 %240 }
 0x124   : > { %376 = vst.msk [vmem:[%s584_s8 + $0x68] sm:$0xff] %vm195_vm1, %v241_v22 }
 0x129   : > { %v243_v23 = vpop.permute.xlu1 %242 }
 0x12a   : > { %377 = vst.msk [vmem:[%s584_s8 + $0x70] sm:$0xff] %vm195_vm1, %v243_v23 }
 0x12b   : > { %s384_s22 = sshll.u32 %s534_s13, 5  ;;  %s278_s23 = sshll.u32 %s584_s8, 4  ;;  %s279_s23 = int_to_ptr.vmem [resolvable:$true] %s278_s23 }
 0x12c   : > { %s267_s26 = scalar_lea.hbm %s658_s2, %s384_s22  ;;  %s491_s28 = smov 512  }
 0x12d   : > { %s280_s27 = sshll.u32 %s267_s26, 4  ;;  %397 = sst [smem:[#allocation5]] (%p551_p5), %s491_s28  ;;  %s281_s27 = int_to_ptr.hbm [resolvable:$true] %s280_s27 }
 0x12e   : > { %s492_s29 = smov 1024   ;;  %s493_s30 = smov 4  }
 0x12f   : > { %398 = sst [smem:[#allocation5 + $0x1]] (%p551_p5), %s492_s29  ;;  %s494_s13 = smov 128  }
 0x130   : > { %399 = sst [smem:[#allocation5 + $0x2]] (%p551_p5), %s493_s30  ;;  %s495_s3 = smov 8  }
 0x131   : > { %400 = sst [smem:[#allocation5 + $0x3]] (%p551_p5), %s494_s13  ;;  %s496_s4 = smov [#allocation4]  }
 0x132   : > { %401 = sst [smem:[#allocation5 + $0x4]] (%p551_p5), %s494_s13  ;;  %s497_s5 = smov 0  }
 0x133   : > { %402 = sst [smem:[#allocation5 + $0x5]] (%p551_p5), %s495_s3 }
 0x134   : > { %403 = dma.general (%p551_p5), %s279_s23, 2048, %s281_s27, %s256_s21, %s496_s4, [#allocation5], %s497_s5, 0  }
 0x135 PF: > { %p409_p11 = scmp.ge.s32.totalorder %s486_s12, 2  ;;  %s308_s6 = sand.u32 1, %s474_s9  }
 0x136   : > { %s309_s7 = scalar_lea.sflag [#allocation3], %s308_s6 }
 0x137   : > { %p406_p12 = pnand %p409_p11, %p555_p6 }
 0x139   : > { %p407_p13 = pneg %p406_p12 }
 0x13b   : > { %469 = dma.done.wait (%p407_p13), %s309_s7, 2048  }
 0x13c   : > { %471 = vsyncadd (%p407_p13), %s309_s7, 4294965248  ;;  %p12_p0 = scmp.ge.s32.totalorder %s538_s15, 4   ;;  %s661_s9 = smov %s478_s10 }
 0x13d   : > { %s662_s10 = smov %s482_s11  ;;  %s663_s11 = smov %s549_s18 }
 0x13e   : > { %s664_s12 = smov %s538_s15  ;;  %14 = sbr.rel (!%p12_p0) target bundleno = 3 (0x3), region = 71 }
 0x143   :  { %315 = vsyncpa [#allocation3], 1 }
 0x144   :  { %317 = vsyncpa [#allocation3 + $0x1], 1 }

</bundles_post_ra>
